<compile_context>
chip_gen: v5e
topology: v5e:2x2
jax: 0.10.0
libtpu: 0.0.40
codegen_flags: <defaults>
</compile_context>

<pallas_src>
import functools

import jax
import jax.numpy as jnp
from jax.experimental import pallas as pl
from jax.experimental.pallas import tpu as pltpu


def _round_up(v, m):
    return (v + m - 1) // m * m


def gru_unit_kernel(x_ref, a_ref, wa_ref, wx_ref, wh1_ref, b_ref, o_ref, *,
                    hid_dim, act_fn):
    H = hid_dim
    mxu_dtype = wa_ref.dtype          # bf16 operands, f32 accumulation

    x = x_ref[...]
    x_f32 = x.astype(jnp.float32)

    # Fused a-side matmul: [z | r | h] pre-activations from `a`, bias folded in.
    ga = jnp.dot(a_ref[...].astype(mxu_dtype), wa_ref[...],
                 preferred_element_type=jnp.float32) + b_ref[...]
    # Fused x-side matmul for the z and r gates.
    gx = jnp.dot(x.astype(mxu_dtype), wx_ref[...],
                 preferred_element_type=jnp.float32)

    z = jax.nn.sigmoid(ga[:, :H] + gx[:, :H])          # sigmoid/exp -> EUP slot
    r = jax.nn.sigmoid(ga[:, H:2 * H] + gx[:, H:2 * H])

    h = act_fn(ga[:, 2 * H:] +
               jnp.dot((x_f32 * r).astype(mxu_dtype), wh1_ref[...],
                       preferred_element_type=jnp.float32))

    # out = h*z + x*(1-z) == x + z*(h - x)
    o_ref[...] = (x_f32 + z * (h - x_f32)).astype(o_ref.dtype)


def gru_unit(x, a, packed, *, row_tile=256, act_fn=jnp.tanh):
    """x, a: [N, H] activations (feature last). `packed`: dict from pack_params().

    row_tile: rows per grid step. Sweep 128/256/512 per generation (v6e can
    afford 512-1024; v7x should keep the grid >= 2 steps so both TCs work).
    act_fn: the module's `act` (tanh in the reference usage).
    """
    N, H = x.shape
    assert a.shape == (N, H)

    # Clamp the row tile to (padded) N and pad N up to a tile multiple.
    tile = _round_up(min(row_tile, _round_up(N, 8)), 8)
    n_pad = _round_up(N, tile)
    if n_pad != N:
        pad = ((0, n_pad - N), (0, 0))
        x_p = jnp.pad(x, pad)
        a_p = jnp.pad(a, pad)
    else:
        x_p, a_p = x, a

    # NOTE: for production H >= 128 the output block is lane-dense and the
    # gate slices fall on 128-lane boundaries; for H < 128 masked stores /
    # lane shifts are accepted (relayout plumbing would cost more than it saves
    # at these sizes).
    row_spec = pl.BlockSpec((tile, H), lambda i: (i, 0))

    # Grid-invariant operands: constant index_map -> never re-fetched; single
    # buffer halves their VMEM footprint (matters on v7x's 64 MiB VMEM).
    const_spec = functools.partial(pl.BlockSpec,
                                   index_map=lambda i: (0, 0),
                                   pipeline_mode=pl.Buffered(1))
    in_specs = [
        row_spec,                     # x
        row_spec,                     # a
        const_spec((H, 3 * H)),       # wa  = [Wz0 | Wr0 | Wh0]
        const_spec((H, 2 * H)),       # wx  = [Wz1 | Wr1]
        const_spec((H, H)),           # wh1
        const_spec((1, 3 * H)),       # folded bias
    ]

    # VMEM budget sized from actual tiles (2x headroom), clamped to 64 MiB so
    # the request is valid on v7x as well as v5e/v6e.
    w_bytes = 6 * H * H * jnp.dtype(packed["wa"].dtype).itemsize
    act_bytes = 3 * 2 * tile * H * 4          # x, a, out; double-buffered
    tmp_bytes = 9 * tile * H * 4              # in-kernel f32 intermediates
    vmem_limit = int(min(64 * 2 ** 20,
                         max(32 * 2 ** 20,
                             2 * (w_bytes + act_bytes + tmp_bytes))))

    grid_spec = pltpu.PrefetchScalarGridSpec(
        num_scalar_prefetch=0,
        grid=(n_pad // tile,),
        in_specs=in_specs,
        out_specs=row_spec,
    )

    out = pl.pallas_call(
        functools.partial(gru_unit_kernel, hid_dim=H, act_fn=act_fn),
        out_shape=jax.ShapeDtypeStruct((n_pad, H), x.dtype),
        grid_spec=grid_spec,
        compiler_params=pltpu.CompilerParams(
            dimension_semantics=("parallel",),
            vmem_limit_bytes=vmem_limit),
    )(x_p, a_p, packed["wa"], packed["wx"], packed["wh1"], packed["b"])

    return out[:N] if n_pad != N else out


def init_params(key, hid_dim):
    """Xavier-uniform weights (gain=1), zero biases, matching the PyTorch module.
    Weights are stored pre-transposed as [in, out] so y = v @ W + b."""
    names = ["z0", "z1", "r0", "r1", "h0", "h1"]
    keys = jax.random.split(key, len(names))
    bound = (6.0 / (hid_dim + hid_dim)) ** 0.5
    params = {}
    for k, name in zip(keys, names):
        w = jax.random.uniform(k, (hid_dim, hid_dim), jnp.float32,
                               minval=-bound, maxval=bound)
        params[f"w{name}"] = w.T                       # [in, out]
        params[f"b{name}"] = jnp.zeros((1, hid_dim), jnp.float32)
    return params


def pack_params(params, *, mxu_dtype=jnp.bfloat16):
    """Fuse weights/biases for the kernel:
      wa  = [Wz0 | Wr0 | Wh0]             (H, 3H)  - applied to a
      wx  = [Wz1 | Wr1]                   (H, 2H)  - applied to x
      wh1 =  Wh1                          (H, H)   - applied to x*r
      b   = [bz0+bz1 | br0+br1 | bh0+bh1] (1, 3H)  - folded bias (f32)
    """
    wa = jnp.concatenate([params["wz0"], params["wr0"], params["wh0"]], axis=1)
    wx = jnp.concatenate([params["wz1"], params["wr1"]], axis=1)
    b = jnp.concatenate([params["bz0"] + params["bz1"],
                         params["br0"] + params["br1"],
                         params["bh0"] + params["bh1"]], axis=1)
    return {"wa": wa.astype(mxu_dtype),
            "wx": wx.astype(mxu_dtype),
            "wh1": params["wh1"].astype(mxu_dtype),
            "b": b.astype(jnp.float32)}


def gru_unit_ref(x, a, params):
    def lin(v, w, b):
        return v @ w + b
    z = jax.nn.sigmoid(lin(a, params["wz0"], params["bz0"]) +
                       lin(x, params["wz1"], params["bz1"]))
    r = jax.nn.sigmoid(lin(a, params["wr0"], params["br0"]) +
                       lin(x, params["wr1"], params["br1"]))
    h = jnp.tanh(lin(a, params["wh0"], params["bh0"]) +
                 lin(x * r, params["wh1"], params["bh1"]))
    return h * z + x * (1.0 - z)


if __name__ == "__main__":
    hid_dim = 32
    key = jax.random.PRNGKey(0)
    k_params, k_x, k_a = jax.random.split(key, 3)

    params = init_params(k_params, hid_dim)
    packed = pack_params(params)                  # bf16 MXU operands

    # Small demo shape (single row block).
    n_rows = 16
    x = jax.random.normal(k_x, (n_rows, hid_dim), jnp.float32)
    a = jax.random.normal(k_a, (n_rows, hid_dim), jnp.float32)
    out = jax.block_until_ready(gru_unit(x, a, packed))
    ref = gru_unit_ref(x, a, params)
    assert out.shape == (n_rows, hid_dim)
    # bf16 MXU operands vs f32 reference -> relaxed tolerance.
    assert jnp.allclose(out, ref, atol=2e-2, rtol=2e-2), "mismatch (small)"

    # Second run exercising a multi-step grid + row padding (N % tile != 0).
    n_rows2 = 200
    k_x2, k_a2 = jax.random.split(k_x)
    x2 = jax.random.normal(k_x2, (n_rows2, hid_dim), jnp.float32)
    a2 = jax.random.normal(k_a2, (n_rows2, hid_dim), jnp.float32)
    out2 = jax.block_until_ready(gru_unit(x2, a2, packed, row_tile=128))
    ref2 = gru_unit_ref(x2, a2, params)
    assert out2.shape == (n_rows2, hid_dim)
    assert jnp.allclose(out2, ref2, atol=2e-2, rtol=2e-2), "mismatch (tiled)"

    print("KERNEL_OK")
</pallas_src>

<mosaic_0001>
module attributes {stable_mosaic.version = 11 : i64} {
  func.func @gru_unit_kernel(%arg0: i32, %arg1: memref<16x32xf32, #tpu.memory_space<vmem>>, %arg2: memref<16x32xf32, #tpu.memory_space<vmem>>, %arg3: memref<32x96xbf16, #tpu.memory_space<vmem>>, %arg4: memref<32x64xbf16, #tpu.memory_space<vmem>>, %arg5: memref<32x32xbf16, #tpu.memory_space<vmem>>, %arg6: memref<1x96xf32, #tpu.memory_space<vmem>>, %arg7: memref<16x32xf32, #tpu.memory_space<vmem>>) attributes {dimension_semantics = [#tpu.dimension_semantics<parallel>], iteration_bounds = array<i64: 1>, scalar_prefetch = 0 : i64, scratch_operands = 0 : i64, tpu.core_type = #tpu.core_type<tc>, window_params = [{transform_indices = @transform_0, window_bounds = array<i64: 16, 32>}, {transform_indices = @transform_1, window_bounds = array<i64: 16, 32>}, {pipeline_mode = #tpu.pipeline_mode<synchronous>, transform_indices = @transform_2, window_bounds = array<i64: 32, 96>}, {pipeline_mode = #tpu.pipeline_mode<synchronous>, transform_indices = @transform_3, window_bounds = array<i64: 32, 64>}, {pipeline_mode = #tpu.pipeline_mode<synchronous>, transform_indices = @transform_4, window_bounds = array<i64: 32, 32>}, {pipeline_mode = #tpu.pipeline_mode<synchronous>, transform_indices = @transform_5, window_bounds = array<i64: 1, 96>}, {transform_indices = @transform_6, window_bounds = array<i64: 16, 32>}]} {
    %c0 = arith.constant 0 : index
    %c0_0 = arith.constant 0 : index
    %0 = vector.load %arg1[%c0, %c0_0] : memref<16x32xf32, #tpu.memory_space<vmem>>, vector<16x32xf32>
    %c0_1 = arith.constant 0 : index
    %c0_2 = arith.constant 0 : index
    %1 = vector.load %arg2[%c0_1, %c0_2] : memref<16x32xf32, #tpu.memory_space<vmem>>, vector<16x32xf32>
    %2 = arith.truncf %1 : vector<16x32xf32> to vector<16x32xbf16>
    %c0_3 = arith.constant 0 : index
    %c0_4 = arith.constant 0 : index
    %3 = vector.load %arg3[%c0_3, %c0_4] : memref<32x96xbf16, #tpu.memory_space<vmem>>, vector<32x96xbf16>
    %cst = arith.constant dense<0.000000e+00> : vector<16x96xf32>
    %4 = tpu.matmul %2, %3, %cst {dimension_numbers = #tpu.dot_dimension_numbers<[1], [0], [0], [1], [0, 0, 1, 1], [], []>} : vector<16x32xbf16>, vector<32x96xbf16>, vector<16x96xf32> -> vector<16x96xf32>
    %c0_5 = arith.constant 0 : index
    %c0_6 = arith.constant 0 : index
    %5 = vector.load %arg6[%c0_5, %c0_6] : memref<1x96xf32, #tpu.memory_space<vmem>>, vector<1x96xf32>
    %6 = vector.broadcast %5 : vector<1x96xf32> to vector<16x96xf32>
    %7 = arith.addf %4, %6 : vector<16x96xf32>
    %8 = arith.truncf %0 : vector<16x32xf32> to vector<16x32xbf16>
    %c0_7 = arith.constant 0 : index
    %c0_8 = arith.constant 0 : index
    %9 = vector.load %arg4[%c0_7, %c0_8] : memref<32x64xbf16, #tpu.memory_space<vmem>>, vector<32x64xbf16>
    %cst_9 = arith.constant dense<0.000000e+00> : vector<16x64xf32>
    %10 = tpu.matmul %8, %9, %cst_9 {dimension_numbers = #tpu.dot_dimension_numbers<[1], [0], [0], [1], [0, 0, 1, 1], [], []>} : vector<16x32xbf16>, vector<32x64xbf16>, vector<16x64xf32> -> vector<16x64xf32>
    %11 = vector.extract_strided_slice %7 {offsets = [0, 0], sizes = [16, 32], strides = [1, 1]} : vector<16x96xf32> to vector<16x32xf32>
    %12 = vector.extract_strided_slice %10 {offsets = [0, 0], sizes = [16, 32], strides = [1, 1]} : vector<16x64xf32> to vector<16x32xf32>
    %13 = arith.addf %11, %12 : vector<16x32xf32>
    %14 = arith.negf %13 : vector<16x32xf32>
    %15 = math.exp %14 : vector<16x32xf32>
    %cst_10 = arith.constant 1.000000e+00 : f32
    %16 = vector.broadcast %cst_10 : f32 to vector<16x32xf32>
    %17 = arith.addf %16, %15 : vector<16x32xf32>
    %18 = arith.divf %16, %17 : vector<16x32xf32>
    %19 = vector.extract_strided_slice %7 {offsets = [0, 32], sizes = [16, 32], strides = [1, 1]} : vector<16x96xf32> to vector<16x32xf32>
    %20 = vector.extract_strided_slice %10 {offsets = [0, 32], sizes = [16, 32], strides = [1, 1]} : vector<16x64xf32> to vector<16x32xf32>
    %21 = arith.addf %19, %20 : vector<16x32xf32>
    %22 = arith.negf %21 : vector<16x32xf32>
    %23 = math.exp %22 : vector<16x32xf32>
    %cst_11 = arith.constant 1.000000e+00 : f32
    %24 = vector.broadcast %cst_11 : f32 to vector<16x32xf32>
    %25 = arith.addf %24, %23 : vector<16x32xf32>
    %26 = arith.divf %24, %25 : vector<16x32xf32>
    %27 = vector.extract_strided_slice %7 {offsets = [0, 64], sizes = [16, 32], strides = [1, 1]} : vector<16x96xf32> to vector<16x32xf32>
    %28 = arith.mulf %0, %26 : vector<16x32xf32>
    %29 = arith.truncf %28 : vector<16x32xf32> to vector<16x32xbf16>
    %c0_12 = arith.constant 0 : index
    %c0_13 = arith.constant 0 : index
    %30 = vector.load %arg5[%c0_12, %c0_13] : memref<32x32xbf16, #tpu.memory_space<vmem>>, vector<32x32xbf16>
    %cst_14 = arith.constant dense<0.000000e+00> : vector<16x32xf32>
    %31 = tpu.matmul %29, %30, %cst_14 {dimension_numbers = #tpu.dot_dimension_numbers<[1], [0], [0], [1], [0, 0, 1, 1], [], []>} : vector<16x32xbf16>, vector<32x32xbf16>, vector<16x32xf32> -> vector<16x32xf32>
    %32 = arith.addf %27, %31 : vector<16x32xf32>
    %33 = math.tanh %32 : vector<16x32xf32>
    %34 = arith.subf %33, %0 : vector<16x32xf32>
    %35 = arith.mulf %18, %34 : vector<16x32xf32>
    %36 = arith.addf %0, %35 : vector<16x32xf32>
    %c0_15 = arith.constant 0 : index
    %c0_16 = arith.constant 0 : index
    %37 = vector.load %arg7[%c0_15, %c0_16] : memref<16x32xf32, #tpu.memory_space<vmem>>, vector<16x32xf32>
    tpu.vector_store %arg7[%c0_15, %c0_16], %36 {strides = array<i32>} : memref<16x32xf32, #tpu.memory_space<vmem>>, vector<16x32xf32>,
    return
  }
  func.func @transform_0(%arg0: i32) -> (i32, i32) {
    %c0_i32 = arith.constant 0 : i32
    %c0_i32_0 = arith.constant 0 : i32
    return %arg0, %c0_i32 : i32, i32
  }
  func.func @transform_1(%arg0: i32) -> (i32, i32) {
    %c0_i32 = arith.constant 0 : i32
    %c0_i32_0 = arith.constant 0 : i32
    return %arg0, %c0_i32 : i32, i32
  }
  func.func @transform_2(%arg0: i32) -> (i32, i32) {
    %c0_i32 = arith.constant 0 : i32
    %c0_i32_0 = arith.constant 0 : i32
    %c0_i32_1 = arith.constant 0 : i32
    return %c0_i32, %c0_i32_0 : i32, i32
  }
  func.func @transform_3(%arg0: i32) -> (i32, i32) {
    %c0_i32 = arith.constant 0 : i32
    %c0_i32_0 = arith.constant 0 : i32
    %c0_i32_1 = arith.constant 0 : i32
    return %c0_i32, %c0_i32_0 : i32, i32
  }
  func.func @transform_4(%arg0: i32) -> (i32, i32) {
    %c0_i32 = arith.constant 0 : i32
    %c0_i32_0 = arith.constant 0 : i32
    %c0_i32_1 = arith.constant 0 : i32
    return %c0_i32, %c0_i32_0 : i32, i32
  }
  func.func @transform_5(%arg0: i32) -> (i32, i32) {
    %c0_i32 = arith.constant 0 : i32
    %c0_i32_0 = arith.constant 0 : i32
    %c0_i32_1 = arith.constant 0 : i32
    return %c0_i32, %c0_i32_0 : i32, i32
  }
  func.func @transform_6(%arg0: i32) -> (i32, i32) {
    %c0_i32 = arith.constant 0 : i32
    %c0_i32_0 = arith.constant 0 : i32
    return %arg0, %c0_i32 : i32, i32
  }
}

</mosaic_0001>

<bundles_post_ra>
// kernel: tpu_custom_call.1
= control target key start
LH: loop header
LB: loop body
LE: loop exit
PB: predicated region body
PF: predicated region fallthrough
CT: control target
= control target key end

     0   :  { %11 = vsyncpa [#allocation3], 0  ;;  %s637_s0 = inlined_call_operand.hbm [shape: f32[16,32], index: 0, kind: input, shape index: {}]   ;;  %s638_s1 = inlined_call_operand.hbm [shape: f32[16,32], index: 1, kind: input, shape index: {}]   ;;  %s639_s2 = inlined_call_operand.hbm [shape: bf16[32,96], index: 2, kind: input, shape index: {}]   ;;  %s640_s3 = inlined_call_operand.hbm [shape: bf16[32,64], index: 3, kind: input, shape index: {}]   ;;  %s641_s4 = inlined_call_operand.hbm [shape: bf16[32,32], index: 4, kind: input, shape index: {}]   ;;  %s642_s5 = inlined_call_operand.vmem [shape: f32[1,96], index: 5, kind: input, shape index: {}]   ;;  %s643_s6 = inlined_call_operand.hbm [shape: f32[16,32], index: 6, kind: output, shape index: {}]  }
   0x1   :  { %12 = vsyncpa [#allocation6], 0 }
   0x2   :  { %13 = vsyncpa [#allocation9], 0 }
   0x3   :  { %14 = vsyncpa [#allocation4], 0  ;;  %s32_s23 = sshll.u32 %s638_s1, 4  ;;  %s532_s24 = smov [#allocation5]   ;;  %s33_s23 = int_to_ptr.hbm [resolvable:$true] %s32_s23 }
   0x4   :  { %s34_s25 = sshll.u32 %s532_s24, 4  ;;  %s533_s26 = smov 128   ;;  %s35_s25 = int_to_ptr.vmem [resolvable:$true] %s34_s25 }
   0x5   :  { %s534_s27 = smov 8   ;;  %s58_s30 = sshll.u32 %s640_s3, 4  ;;  %s59_s30 = int_to_ptr.hbm [resolvable:$true] %s58_s30 }
   0x6   :  { %40 = dma.hbm_to_vmem [thread:$0]  %s33_s23, 256, %s35_s25, [#allocation6], %s533_s26, %s533_s26, %s534_s27  }
   0x7   :  { %s535_s7 = smov [#allocation8]   ;;  %s19_s1 = sshll.u32 %s637_s0, 4  ;;  %s20_s1 = int_to_ptr.hbm [resolvable:$true] %s19_s1 }
   0x8   :  { %s60_s8 = sshll.u32 %s535_s7, 4  ;;  %s536_s11 = smov 64   ;;  %s61_s8 = int_to_ptr.vmem [resolvable:$true] %s60_s8 }
   0x9   :  { %s537_s12 = smov 4   ;;  %s45_s15 = sshll.u32 %s639_s2, 4  ;;  %s46_s15 = int_to_ptr.hbm [resolvable:$true] %s45_s15 }
   0xa   :  { %66 = dma.hbm_to_vmem [thread:$0]  %s59_s30, 256, %s61_s8, [#allocation9], %s536_s11, %s536_s11, %s537_s12  }
   0xb   :  { %s538_s16 = smov [#allocation2]   ;;  %s539_s0 = smov [#allocation7]  }
   0xc   :  { %s21_s3 = sshll.u32 %s538_s16, 4  ;;  %s47_s17 = sshll.u32 %s539_s0, 4  ;;  %s22_s3 = int_to_ptr.vmem [resolvable:$true] %s21_s3  ;;  %s48_s17 = int_to_ptr.vmem [resolvable:$true] %s47_s17 }
   0xd   :  { %27 = dma.hbm_to_vmem [thread:$0]  %s20_s1, 256, %s22_s3, [#allocation3], %s533_s26, %s533_s26, %s534_s27  }
   0xe   :  { %s71_s20 = sshll.u32 %s641_s4, 4  ;;  %s540_s2 = smov [#allocation10]   ;;  %s72_s20 = int_to_ptr.hbm [resolvable:$true] %s71_s20 }
   0xf   :  { %53 = dma.hbm_to_vmem [thread:$0]  %s46_s15, 256, %s48_s17, [#allocation6], %s536_s11, %s536_s11, %s537_s12  }
  0x10   :  { %s73_s21 = sshll.u32 %s540_s2, 4  ;;  %s74_s21 = int_to_ptr.vmem [resolvable:$true] %s73_s21 }
  0x11   :  { %79 = dma.hbm_to_vmem [thread:$0]  %s72_s20, 256, %s74_s21, [#allocation9], %s536_s11, %s536_s11, %s537_s12  }
  0x12   :  { %524 = dma.done.wait [#allocation3], 256  }
  0x13   :  { %525 = vsyncadd [#allocation3], 4294967040 }
  0x14   :  { %526 = dma.done.wait [#allocation6], 512  }
  0x15   :  { %527 = vsyncadd [#allocation6], 4294966784 }
  0x16   :  { %528 = dma.done.wait [#allocation9], 512  }
  0x17   :  { %529 = vsyncadd [#allocation9], 4294966784  ;;  %v351_v0 = vld [vmem:[#allocation7 + $0x8] sm:$0xff]  ;;  %v353_v1 = vld [vmem:[#allocation8 + $0x8] sm:$0xff]  ;;  %vm128_vm0 = vcmask 261120   ;;  %s542_s23 = smov [#allocation11]  }
  0x18   :  { %v350_v2 = vld [vmem:[#allocation7] sm:$0xff]  ;;  %v352_v3 = vld [vmem:[#allocation8] sm:$0xff]  ;;  %v106_v5 = vld [vmem:[#allocation5 + $0x8] sm:$0xff]  ;;  %138 = vmatpush.bf16.msra.mxu0 %v351_v0  ;;  %172 = vmatpush.bf16.msra.mxu1 %v353_v1  ;;  %s304_s24 = sshll.u32 %s542_s23, 4  ;;  %s306_s29 = sshll.u32 %s643_s6, 4  ;;  %s305_s24 = int_to_ptr.vmem [resolvable:$true] %s304_s24  ;;  %s307_s29 = int_to_ptr.hbm [resolvable:$true] %s306_s29 }
  0x19   :  { %v105_v4 = vld [vmem:[#allocation5] sm:$0xff]  ;;  %v605_v6 = vld [vmem:[#allocation2] sm:$0xff]  ;;  %v607_v7 = vld [vmem:[#allocation2 + $0x8] sm:$0xff] }
  0x1a   :  { %278 = vrot.lane.b32.xlu2 %v605_v6, %s536_s11  ;;  %v107_v8 = vpack.c.bf16 %v106_v5, %v105_v4  ;;  %v146_v9 = vpack.c.bf16 %v607_v7, %v605_v6  ;;  %v367_v10 = vld [vmem:[%s642_s5] ss:$0 sm:$0xff]  ;;  %s541_s5 = smov 96   ;;  %v355_v45 = vld [vmem:[#allocation10 + $0x8] sm:$0xff] }
  0x1b   :  { %256 = vmatpush.bf16.msra.mxu2 %v355_v45  ;;  %v354_v46 = vld [vmem:[#allocation10] sm:$0xff] }
  0x1c   :  { %139 = vmatpush.bf16.msra.mxu0 %v350_v2  ;;  %173 = vmatpush.bf16.msra.mxu1 %v352_v3 }
  0x1f   :  { %329 = vmatmul.msk.bf16.vlgmr.msra.gmra.mxu0 %vm128_vm0, %v107_v8  ;;  %338 = vmatmul.msk.bf16.vlgmr.msra.gmra.mxu1 %vm128_vm0, %v146_v9 }
  0x20   :  { %257 = vmatpush.bf16.msra.mxu2 %v354_v46 }
  0x22   :  { %280 = vrot.lane.b32.xlu2 %v607_v7, %s536_s11 }
  0x74   :  { %v279_v56 = vpop.permute.xlu2 %278 }
  0x7c   :  { %v281_v61 = vpop.permute.xlu2 %280 }
  0x9c   :  { %v141_v11 = vpop.f32.mrf.mxu0  ;;  %v175_v12 = vpop.f32.mrf.mxu1 }
  0x9d   :  { %v142_v13 = vadd.f32 %v367_v10, %v141_v11 }
  0x9f   :  { %v180_v14 = vadd.f32 %v175_v12, %v142_v13 }
  0xa1   :  { %v339_v15 = vmul.f32 -1.442695, %v180_v14 }
  0xa3   :  { %368 = vpow2.f32 %v339_v15 }
  0xa4   :  { %v143_v16 = vpop.f32.mrf.mxu0  ;;  %v177_v18 = vpop.f32.mrf.mxu1 }
  0xa5   :  { %v144_v17 = vadd.f32 %v367_v10, %v143_v16 }
  0xa7   :  { %v181_v19 = vadd.f32 %v177_v18, %v144_v17 }
  0xa9   :  { %v369_v20 = vpop.eup %368  ;;  %v340_v21 = vmul.f32 -1.442695, %v181_v19 }
  0xaa   :  { %v188_v22 = vadd.f32 1.0, %v369_v20 }
  0xab   :  { %370 = vpow2.f32 %v340_v21 }
  0xac   :  { %372 = vrcp.f32 %v188_v22  ;;  %v201_v28 = vand.u32 2147483648, %v188_v22  ;;  %v199_v30 = vand.u32 2147483647, %v188_v22  ;;  %vm195_vm2 = vweird.f32 %v188_v22 }
  0xae   :  { %v202_v33 = vor.u32 1.1754944e-38, %v201_v28  ;;  %vm200_vm4 = vcmp.eq.f32.partialorder %v199_v30, 8.507059e+37 }
  0xb1   :  { %v371_v23 = vpop.eup %370 }
  0xb2   :  { %v373_v24 = vpop.eup %372  ;;  %v189_v25 = vadd.f32 1.0, %v371_v23 }
  0xb3   :  { %v191_v26 = vmul.f32 %v373_v24, %v188_v22  ;;  %vm196_vm1 = vweird.f32 %v373_v24 }
  0xb4   :  { %374 = vrcp.f32 %v189_v25  ;;  %vm197_vm3 = vmor %vm195_vm2, %vm196_vm1  ;;  %v216_v38 = vand.u32 2147483648, %v189_v25  ;;  %v214_v40 = vand.u32 2147483647, %v189_v25  ;;  %vm210_vm6 = vweird.f32 %v189_v25 }
  0xb5   :  { %v192_v27 = vsub.f32 1.0, %v191_v26 }
  0xb6   :  { %v217_v42 = vor.u32 1.1754944e-38, %v216_v38  ;;  %vm215_vm8 = vcmp.eq.f32.partialorder %v214_v40, 8.507059e+37 }
  0xb7   :  { %v193_v29 = vmul.f32 %v373_v24, %v192_v27 }
  0xb9   :  { %v194_v31 = vadd.f32 %v373_v24, %v193_v29 }
  0xba   :  { %v375_v32 = vpop.eup %374 }
  0xbb   :  { %v198_v34 = vsel %vm197_vm3, %v373_v24, %v194_v31  ;;  %v206_v35 = vmul.f32 %v375_v32, %v189_v25  ;;  %vm211_vm5 = vweird.f32 %v375_v32 }
  0xbc   :  { %v203_v36 = vsel %vm200_vm4, %v202_v33, %v198_v34  ;;  %vm212_vm7 = vmor %vm210_vm6, %vm211_vm5 }
  0xbd   :  { %222 = vrot.lane.b32.xlu0 %v203_v36, %s541_s5  ;;  %v207_v37 = vsub.f32 1.0, %v206_v35 }
  0xbf   :  { %v208_v39 = vmul.f32 %v375_v32, %v207_v37 }
  0xc1   :  { %v209_v41 = vadd.f32 %v375_v32, %v208_v39 }
  0xc3   :  { %v213_v43 = vsel %vm212_vm7, %v375_v32, %v209_v41 }
  0xc4   :  { %v218_v44 = vsel %vm215_vm8, %v217_v42, %v213_v43 }
  0xc5   :  { %224 = vrot.lane.b32.xlu0 %v218_v44, %s541_s5 }
 0x12f   :  { %v223_v47 = vpop.permute.xlu0 %222 }
 0x130   :  { %v228_v49 = vmul.f32 %v223_v47, %v605_v6 }
 0x137   :  { %v225_v48 = vpop.permute.xlu0 %224 }
 0x138   :  { %v229_v50 = vmul.f32 %v225_v48, %v607_v7 }
 0x13a   :  { %v230_v51 = vpack.c.bf16 %v229_v50, %v228_v49 }
 0x13c   :  { %349 = vmatmul.msk.bf16.vlgmr.msra.gmra.mxu2 %vm128_vm0, %v230_v51 }
 0x1bf   :  { %v259_v52 = vpop.f32.mrf.mxu2 }
 0x1c0   :  { %266 = vrot.lane.b32.xlu1 %v259_v52, %s536_s11 }
 0x1c7   :  { %v261_v53 = vpop.f32.mrf.mxu2 }
 0x1c8   :  { %268 = vrot.lane.b32.xlu1 %v261_v53, %s536_s11 }
 0x232   :  { %v267_v54 = vpop.permute.xlu1 %266 }
 0x233   :  { %v272_v55 = vadd.f32 %v267_v54, %v142_v13 }
 0x235   :  { %376 = vtanh.f32 %v272_v55 }
 0x23a   :  { %v269_v57 = vpop.permute.xlu1 %268 }
 0x23b   :  { %v377_v58 = vpop.eup %376  ;;  %v273_v59 = vadd.f32 %v269_v57, %v144_v17 }
 0x23c   :  { %v284_v60 = vsub.f32 %v377_v58, %v279_v56 }
 0x23d   :  { %378 = vtanh.f32 %v273_v59 }
 0x23e   :  { %288 = vrot.lane.b32.xlu0 %v284_v60, %s536_s11 }
 0x243   :  { %v379_v62 = vpop.eup %378 }
 0x244   :  { %v285_v63 = vsub.f32 %v379_v62, %v281_v61 }
 0x246   :  { %290 = vrot.lane.b32.xlu1 %v285_v63, %s536_s11 }
 0x2b0   :  { %v289_v0 = vpop.permute.xlu0 %288 }
 0x2b1   :  { %v294_v1 = vmul.f32 %v289_v0, %v203_v36 }
 0x2b3   :  { %v296_v2 = vadd.f32 %v294_v1, %v605_v6 }
 0x2b5   :  { %298 = vst.msk [vmem:[#allocation11] sm:$0xff] %vm128_vm0, %v296_v2 }
 0x2b8   :  { %v291_v3 = vpop.permute.xlu1 %290 }
 0x2b9   :  { %v295_v4 = vmul.f32 %v291_v3, %v218_v44 }
 0x2bb   :  { %v297_v5 = vadd.f32 %v295_v4, %v607_v7 }
 0x2bd   :  { %299 = vst.msk [vmem:[#allocation11 + $0x8] sm:$0xff] %vm128_vm0, %v297_v5 }
 0x2be   :  { %312 = dma.vmem_to_hbm [thread:$0]  %s305_s24, 256, %s307_s29, [#allocation4], %s533_s26, %s533_s26, %s534_s27  }
 0x2bf   :  { %530 = dma.done.wait [#allocation4], 256  }
 0x2c0   :  { %531 = vsyncadd [#allocation4], 4294967040 }
 0x2c1   :  { %317 = vsyncpa [#allocation3], 1 }
 0x2c2   :  { %318 = vsyncpa [#allocation6], 1 }
 0x2c3   :  { %319 = vsyncpa [#allocation9], 1 }
 0x2c4   :  { %320 = vsyncpa [#allocation4], 1 }

</bundles_post_ra>
